<compile_context>
chip_gen: v7x
topology: tpu7x:2x2x1
jax: 0.10.0
libtpu: 0.0.40
codegen_flags: <defaults>
</compile_context>

<pallas_src>
import jax
import jax.numpy as jnp
from jax import lax
from jax.experimental import pallas as pl
from jax.experimental.pallas import tpu as pltpu

HIDDEN1 = 128
HIDDEN2 = 64
HIDDEN2_PAD = 128   # lane-dense padded width of the second hidden layer
LANE = 128
SUBLANE = 8


def _round_up(n, m):
    return (n + m - 1) // m * m


def dqn_mlp_kernel(x_ref, w1_ref, b1_ref, w2_ref, b2_ref, w3t_ref, b3t_ref, out_ref):
    cdt = w1_ref.dtype                       # compute dtype of MXU operands (f32 or bf16)
    x = x_ref[...].astype(cdt)               # in-kernel cast; no-op for f32 weights

    # Layer 1: Linear(input_dim -> 128) + ReLU (f32 accumulation, f32 elementwise)
    h1 = jnp.dot(x, w1_ref[...], preferred_element_type=jnp.float32) + b1_ref[...]
    h1 = jnp.maximum(h1, 0.0)

    # Layer 2: Linear(128 -> 128 padded; true width 64) + ReLU
    h2 = jnp.dot(h1.astype(cdt), w2_ref[...],
                 preferred_element_type=jnp.float32) + b2_ref[...]
    h2 = jnp.maximum(h2, 0.0)

    # Layer 3, transposed (NT matmul): y_t[o, t] = sum_n w3t[o, n] * h2[t, n] + b3[o].
    # Output block is [out_sub, tile]: lane dim = batch (multiple of 128) -> unmasked,
    # narrow stores; padded sublanes (out_dim..out_sub) are exactly zero.
    y_t = lax.dot_general(
        w3t_ref[...], h2.astype(cdt),
        dimension_numbers=(((1,), (1,)), ((), ())),
        preferred_element_type=jnp.float32) + b3t_ref[...]

    # NOTE: an action-argmax over the first out_dim sublanes could be fused here to skip
    # the Q-value writeback entirely when the caller only needs actions.
    out_ref[...] = y_t.astype(out_ref.dtype)


def init_dqn_params(key, input_dim, output_dim):
    """Logical (unpadded) params mimicking torch.nn.Linear default init.

    w1/w2/w3 stored as [in_features, out_features]; biases as [1, out]."""
    dims = [(input_dim, HIDDEN1), (HIDDEN1, HIDDEN2), (HIDDEN2, output_dim)]
    params = {}
    keys = jax.random.split(key, 2 * len(dims))
    for i, (fan_in, fan_out) in enumerate(dims):
        bound = 1.0 / float(fan_in) ** 0.5
        params[f"w{i + 1}"] = jax.random.uniform(
            keys[2 * i], (fan_in, fan_out), jnp.float32, minval=-bound, maxval=bound)
        params[f"b{i + 1}"] = jax.random.uniform(
            keys[2 * i + 1], (1, fan_out), jnp.float32, minval=-bound, maxval=bound)
    return params


def pack_dqn_params(params, compute_dtype=jnp.float32):
    """Pad to lane/sublane-dense widths and cast MXU weight operands to compute_dtype.

    Layer-3 weight/bias are stored transposed ([out_sub, 128] / [out_sub, 1]) so the
    kernel can emit the narrow transposed output directly. Biases stay f32 (added after
    f32 accumulation). All padding entries are zero, so results are unchanged."""
    w1, b1 = params["w1"], params["b1"]
    w2, b2 = params["w2"], params["b2"]
    w3, b3 = params["w3"], params["b3"]
    out_dim = w3.shape[1]
    out_sub = _round_up(out_dim, SUBLANE)

    w2p = jnp.zeros((HIDDEN1, HIDDEN2_PAD), jnp.float32).at[:, :HIDDEN2].set(w2)
    b2p = jnp.zeros((1, HIDDEN2_PAD), jnp.float32).at[:, :HIDDEN2].set(b2)
    w3t = jnp.zeros((out_sub, HIDDEN2_PAD), jnp.float32).at[:out_dim, :HIDDEN2].set(w3.T)
    b3t = jnp.zeros((out_sub, 1), jnp.float32).at[:out_dim, 0].set(b3[0])

    packed = {
        "w1": w1.astype(compute_dtype),
        "b1": b1.astype(jnp.float32),
        "w2": w2p.astype(compute_dtype),
        "b2": b2p,
        "w3t": w3t.astype(compute_dtype),
        "b3t": b3t,
    }
    return packed, out_dim


def _choose_tile(batch, batch_tile):
    """Pick a batch tile: multiple of 128 (lane dim of the transposed output block),
    big enough to amortize per-step overhead, capped at ~1/8 of the batch (never below
    2048) to bound padded-tail waste, and forcing >=2 grid steps whenever the batch
    spans >=2 lane tiles so the 'parallel' axis shards across both v7x TensorCores."""
    pb0 = _round_up(batch, LANE)
    target = max(2048, _round_up(pb0 // 8, LANE))
    tile = min(_round_up(max(batch_tile, LANE), LANE), target, pb0)
    if pb0 >= 2 * LANE:
        tile = min(tile, (pb0 // 2) // LANE * LANE)
    return max(tile, LANE)


def dqn_forward(x, packed, out_dim, *, batch_tile=4096):
    """x: [batch, input_dim] f32 (passed through untouched). Returns f32 [batch, out_dim]."""
    batch, input_dim = x.shape
    out_sub = packed["w3t"].shape[0]

    tile = _choose_tile(batch, batch_tile)
    padded_batch = _round_up(batch, tile)
    xp = x if padded_batch == batch else jnp.pad(x, ((0, padded_batch - batch), (0, 0)))

    grid = (padded_batch // tile,)
    resident = lambda i: (0, 0)   # weights/biases: same block every step -> stay in VMEM

    flops = 2 * padded_batch * (input_dim * HIDDEN1
                                + HIDDEN1 * HIDDEN2_PAD
                                + HIDDEN2_PAD * out_sub)
    param_bytes = sum(int(v.size) * v.dtype.itemsize for v in packed.values())
    bytes_accessed = (padded_batch * input_dim * xp.dtype.itemsize
                      + out_sub * padded_batch * 4
                      + param_bytes)

    out_t = pl.pallas_call(
        dqn_mlp_kernel,
        out_shape=jax.ShapeDtypeStruct((out_sub, padded_batch), jnp.float32),
        grid=grid,
        in_specs=[
            pl.BlockSpec((tile, input_dim), lambda i: (i, 0)),       # x: pipelined
            pl.BlockSpec((input_dim, HIDDEN1), resident),            # w1
            pl.BlockSpec((1, HIDDEN1), resident),                    # b1
            pl.BlockSpec((HIDDEN1, HIDDEN2_PAD), resident),          # w2 (padded)
            pl.BlockSpec((1, HIDDEN2_PAD), resident),                # b2 (padded)
            pl.BlockSpec((out_sub, HIDDEN2_PAD), resident),          # w3 transposed (padded)
            pl.BlockSpec((out_sub, 1), resident),                    # b3 transposed (padded)
        ],
        out_specs=pl.BlockSpec((out_sub, tile), lambda i: (0, i)),   # narrow, lane-dense
        compiler_params=pltpu.CompilerParams(
            dimension_semantics=("parallel",)),                      # megacore on v7x
        cost_estimate=pl.CostEstimate(
            flops=flops, transcendentals=0, bytes_accessed=bytes_accessed),
    )(xp, packed["w1"], packed["b1"], packed["w2"], packed["b2"],
      packed["w3t"], packed["b3t"])

    # Tiny post-pass: slice/transpose [out_dim, batch] -> [batch, out_dim].
    return out_t[:out_dim, :batch].T


def dqn_forward_ref(x, params):
    """Pure-JAX reference (unpadded, f32) for correctness check."""
    h = jnp.maximum(x @ params["w1"] + params["b1"], 0.0)
    h = jnp.maximum(h @ params["w2"] + params["b2"], 0.0)
    return h @ params["w3"] + params["b3"]


if __name__ == "__main__":
    key = jax.random.PRNGKey(0)
    k_params, k_x, k_x2 = jax.random.split(key, 3)

    batch = 2
    input_dim = 16   # small state vector
    output_dim = 4   # discrete actions

    params = init_dqn_params(k_params, input_dim, output_dim)
    x = jax.random.normal(k_x, (batch, input_dim), jnp.float32)
    y_ref = dqn_forward_ref(x, params)

    # f32 path (matches reference), tiny batch -> single 128-row tile.
    packed_f32, out_dim = pack_dqn_params(params, jnp.float32)
    y = jax.block_until_ready(dqn_forward(x, packed_f32, out_dim))
    assert y.shape == (batch, output_dim)
    assert jnp.allclose(y, y_ref, atol=1e-4, rtol=1e-4)

    # Multi-tile grid path (>=2 "parallel" steps; exercises pipelining + batch padding).
    x_big = jax.random.normal(k_x2, (300, input_dim), jnp.float32)
    y_big = jax.block_until_ready(dqn_forward(x_big, packed_f32, out_dim))
    assert y_big.shape == (300, output_dim)
    assert jnp.allclose(y_big, dqn_forward_ref(x_big, params), atol=1e-4, rtol=1e-4)

    # bf16 MXU-operand path (x cast to bf16 inside the kernel, f32 accumulation).
    packed_bf16, _ = pack_dqn_params(params, jnp.bfloat16)
    y_bf16 = jax.block_until_ready(dqn_forward(x, packed_bf16, out_dim))
    assert jnp.allclose(y_bf16, y_ref, atol=5e-2, rtol=5e-2)

    print("KERNEL_OK")
</pallas_src>

<mosaic_0001>
module attributes {stable_mosaic.version = 11 : i64} {
  func.func @dqn_mlp_kernel(%arg0: i32, %arg1: memref<128x16xf32, #tpu.memory_space<vmem>>, %arg2: memref<16x128xf32, #tpu.memory_space<vmem>>, %arg3: memref<1x128xf32, #tpu.memory_space<vmem>>, %arg4: memref<128x128xf32, #tpu.memory_space<vmem>>, %arg5: memref<1x128xf32, #tpu.memory_space<vmem>>, %arg6: memref<8x128xf32, #tpu.memory_space<vmem>>, %arg7: memref<8x1xf32, #tpu.memory_space<vmem>>, %arg8: memref<8x128xf32, #tpu.memory_space<vmem>>) attributes {dimension_semantics = [#tpu.dimension_semantics<parallel>], iteration_bounds = array<i64: 1>, scalar_prefetch = 0 : i64, scratch_operands = 0 : i64, tpu.core_type = #tpu.core_type<tc>, window_params = [{transform_indices = @transform_0, window_bounds = array<i64: 128, 16>}, {pipeline_mode = #tpu.pipeline_mode<synchronous>, transform_indices = @transform_1, window_bounds = array<i64: 16, 128>}, {pipeline_mode = #tpu.pipeline_mode<synchronous>, transform_indices = @transform_2, window_bounds = array<i64: 1, 128>}, {pipeline_mode = #tpu.pipeline_mode<synchronous>, transform_indices = @transform_3, window_bounds = array<i64: 128, 128>}, {pipeline_mode = #tpu.pipeline_mode<synchronous>, transform_indices = @transform_4, window_bounds = array<i64: 1, 128>}, {pipeline_mode = #tpu.pipeline_mode<synchronous>, transform_indices = @transform_5, window_bounds = array<i64: 8, 128>}, {pipeline_mode = #tpu.pipeline_mode<synchronous>, transform_indices = @transform_6, window_bounds = array<i64: 8, 1>}, {transform_indices = @transform_7, window_bounds = array<i64: 8, 128>}]} {
    %c0 = arith.constant 0 : index
    %c0_0 = arith.constant 0 : index
    %0 = vector.load %arg1[%c0, %c0_0] : memref<128x16xf32, #tpu.memory_space<vmem>>, vector<128x16xf32>
    %c0_1 = arith.constant 0 : index
    %c0_2 = arith.constant 0 : index
    %1 = vector.load %arg2[%c0_1, %c0_2] : memref<16x128xf32, #tpu.memory_space<vmem>>, vector<16x128xf32>
    %cst = arith.constant dense<0.000000e+00> : vector<128x128xf32>
    %2 = tpu.matmul %0, %1, %cst {dimension_numbers = #tpu.dot_dimension_numbers<[1], [0], [0], [1], [0, 0, 1, 1], [], []>} : vector<128x16xf32>, vector<16x128xf32>, vector<128x128xf32> -> vector<128x128xf32>
    %c0_3 = arith.constant 0 : index
    %c0_4 = arith.constant 0 : index
    %3 = vector.load %arg3[%c0_3, %c0_4] : memref<1x128xf32, #tpu.memory_space<vmem>>, vector<1x128xf32>
    %4 = vector.broadcast %3 : vector<1x128xf32> to vector<128x128xf32>
    %5 = arith.addf %2, %4 : vector<128x128xf32>
    %cst_5 = arith.constant 0.000000e+00 : f32
    %6 = vector.broadcast %cst_5 : f32 to vector<128x128xf32>
    %7 = arith.maximumf %5, %6 : vector<128x128xf32>
    %c0_6 = arith.constant 0 : index
    %c0_7 = arith.constant 0 : index
    %8 = vector.load %arg4[%c0_6, %c0_7] : memref<128x128xf32, #tpu.memory_space<vmem>>, vector<128x128xf32>
    %cst_8 = arith.constant dense<0.000000e+00> : vector<128x128xf32>
    %9 = tpu.matmul %7, %8, %cst_8 {dimension_numbers = #tpu.dot_dimension_numbers<[1], [0], [0], [1], [0, 0, 1, 1], [], []>} : vector<128x128xf32>, vector<128x128xf32>, vector<128x128xf32> -> vector<128x128xf32>
    %c0_9 = arith.constant 0 : index
    %c0_10 = arith.constant 0 : index
    %10 = vector.load %arg5[%c0_9, %c0_10] : memref<1x128xf32, #tpu.memory_space<vmem>>, vector<1x128xf32>
    %11 = vector.broadcast %10 : vector<1x128xf32> to vector<128x128xf32>
    %12 = arith.addf %9, %11 : vector<128x128xf32>
    %cst_11 = arith.constant 0.000000e+00 : f32
    %13 = vector.broadcast %cst_11 : f32 to vector<128x128xf32>
    %14 = arith.maximumf %12, %13 : vector<128x128xf32>
    %c0_12 = arith.constant 0 : index
    %c0_13 = arith.constant 0 : index
    %15 = vector.load %arg6[%c0_12, %c0_13] : memref<8x128xf32, #tpu.memory_space<vmem>>, vector<8x128xf32>
    %cst_14 = arith.constant dense<0.000000e+00> : vector<8x128xf32>
    %16 = tpu.matmul %15, %14, %cst_14 {dimension_numbers = #tpu.dot_dimension_numbers<[1], [1], [0], [0], [0, 0, 1, 0], [], []>} : vector<8x128xf32>, vector<128x128xf32>, vector<8x128xf32> -> vector<8x128xf32>
    %c0_15 = arith.constant 0 : index
    %c0_16 = arith.constant 0 : index
    %17 = vector.load %arg7[%c0_15, %c0_16] : memref<8x1xf32, #tpu.memory_space<vmem>>, vector<8x1xf32>
    %18 = vector.broadcast %17 : vector<8x1xf32> to vector<8x128xf32>
    %19 = arith.addf %16, %18 : vector<8x128xf32>
    %c0_17 = arith.constant 0 : index
    %c0_18 = arith.constant 0 : index
    %20 = vector.load %arg8[%c0_17, %c0_18] : memref<8x128xf32, #tpu.memory_space<vmem>>, vector<8x128xf32>
    tpu.vector_store %arg8[%c0_17, %c0_18], %19 {strides = array<i32>} : memref<8x128xf32, #tpu.memory_space<vmem>>, vector<8x128xf32>,
    return
  }
  func.func @transform_0(%arg0: i32) -> (i32, i32) {
    %c0_i32 = arith.constant 0 : i32
    %c0_i32_0 = arith.constant 0 : i32
    return %arg0, %c0_i32 : i32, i32
  }
  func.func @transform_1(%arg0: i32) -> (i32, i32) {
    %c0_i32 = arith.constant 0 : i32
    %c0_i32_0 = arith.constant 0 : i32
    %c0_i32_1 = arith.constant 0 : i32
    return %c0_i32, %c0_i32_0 : i32, i32
  }
  func.func @transform_2(%arg0: i32) -> (i32, i32) {
    %c0_i32 = arith.constant 0 : i32
    %c0_i32_0 = arith.constant 0 : i32
    %c0_i32_1 = arith.constant 0 : i32
    return %c0_i32, %c0_i32_0 : i32, i32
  }
  func.func @transform_3(%arg0: i32) -> (i32, i32) {
    %c0_i32 = arith.constant 0 : i32
    %c0_i32_0 = arith.constant 0 : i32
    %c0_i32_1 = arith.constant 0 : i32
    return %c0_i32, %c0_i32_0 : i32, i32
  }
  func.func @transform_4(%arg0: i32) -> (i32, i32) {
    %c0_i32 = arith.constant 0 : i32
    %c0_i32_0 = arith.constant 0 : i32
    %c0_i32_1 = arith.constant 0 : i32
    return %c0_i32, %c0_i32_0 : i32, i32
  }
  func.func @transform_5(%arg0: i32) -> (i32, i32) {
    %c0_i32 = arith.constant 0 : i32
    %c0_i32_0 = arith.constant 0 : i32
    %c0_i32_1 = arith.constant 0 : i32
    return %c0_i32, %c0_i32_0 : i32, i32
  }
  func.func @transform_6(%arg0: i32) -> (i32, i32) {
    %c0_i32 = arith.constant 0 : i32
    %c0_i32_0 = arith.constant 0 : i32
    %c0_i32_1 = arith.constant 0 : i32
    return %c0_i32, %c0_i32_0 : i32, i32
  }
  func.func @transform_7(%arg0: i32) -> (i32, i32) {
    %c0_i32 = arith.constant 0 : i32
    %c0_i32_0 = arith.constant 0 : i32
    return %c0_i32, %arg0 : i32, i32
  }
}

</mosaic_0001>

<bundles_post_ra>
// kernel: tpu_custom_call.1
= control target key start
LH: loop header
LB: loop body
LE: loop exit
PB: predicated region body
PF: predicated region fallthrough
CT: control target
= control target key end

     0   :  { %vm52_vm0 = vcmask 130048   ;;  %s1027_s0 = inlined_call_operand.vmem [shape: f32[128,16], index: 0, kind: input, shape index: {}]   ;;  %s1028_s1 = inlined_call_operand.vmem [shape: f32[16,128], index: 1, kind: input, shape index: {}]   ;;  %s1029_s2 = inlined_call_operand.vmem [shape: f32[1,128], index: 2, kind: input, shape index: {}]   ;;  %s1030_s3 = inlined_call_operand.vmem [shape: f32[128,128], index: 3, kind: input, shape index: {}]   ;;  %s1031_s4 = inlined_call_operand.vmem [shape: f32[1,128], index: 4, kind: input, shape index: {}]   ;;  %s1032_s5 = inlined_call_operand.vmem [shape: f32[8,128], index: 5, kind: input, shape index: {}]   ;;  %s1033_s6 = inlined_call_operand.vmem [shape: f32[8,1], index: 6, kind: input, shape index: {}]   ;;  %s1034_s7 = inlined_call_operand.hbm [shape: f32[8,128], index: 7, kind: output, shape index: {}]  }
   0x1   :  { %v43_v0 = vld [vmem:[%s1028_s1] sm:$0xff]  ;;  %v44_v1 = vld [vmem:[%s1028_s1 + $0x8] sm:$0xff]  ;;  %v29_v5 = vld [vmem:[%s1027_s0 + $0x10] sm:$0xff] }
   0x2   :  { %v27_v2 = vld [vmem:[%s1027_s0] sm:$0xff]  ;;  %v742_v3 = vpack.c.bf16 %v44_v1, %v43_v0  ;;  %v28_v4 = vld [vmem:[%s1027_s0 + $0x8] sm:$0xff]  ;;  %v264_v8 = vld [vmem:[%s1030_s3 + $0x10] sm:$0xff] }
   0x3   :  { %627 = vmatprep.mubr.msk.f32.mxu1 %vm52_vm0, %v27_v2  ;;  %v262_v6 = vld [vmem:[%s1030_s3] sm:$0xff]  ;;  %v263_v7 = vld [vmem:[%s1030_s3 + $0x8] sm:$0xff]  ;;  %v265_v10 = vld [vmem:[%s1030_s3 + $0x18] sm:$0xff] }
   0x4   :  { %743 = vmatprep.subr.bf16.mxu1 %v742_v3  ;;  %v746_v9 = vpack.c.bf16 %v263_v7, %v262_v6  ;;  %v30_v11 = vld [vmem:[%s1027_s0 + $0x18] sm:$0xff]  ;;  %v750_v12 = vpack.c.bf16 %v265_v10, %v264_v8  ;;  %v266_v13 = vld [vmem:[%s1030_s3 + $0x20] sm:$0xff]  ;;  %v267_v14 = vld [vmem:[%s1030_s3 + $0x28] sm:$0xff] }
   0x5   :  { %745 = vmatpush3.bf16.msra.mxu1 %v742_v3  ;;  %v31_v15 = vld [vmem:[%s1027_s0 + $0x20] sm:$0xff] }
   0x6   :  { %747 = vmatprep.subr.bf16.mxu1 %v746_v9 }
   0x8   :  { %628 = vmatmul.mubr.msk.f32.vlgmr.msra.gmra.mrb[0].mxu1 %vm52_vm0, %v28_v4 }
   0x9   :  { %630 = vmatprep.mubr.msk.f32.mxu1 %vm52_vm0, %v29_v5  ;;  %749 = vmatpush3.bf16.msra.mxu1 %v746_v9 }
   0xa   :  { %12 = vsyncpa [#allocation3], 0  ;;  %751 = vmatprep.subr.bf16.mxu1 %v750_v12  ;;  %v754_v16 = vpack.c.bf16 %v267_v14, %v266_v13  ;;  %v32_v17 = vld [vmem:[%s1027_s0 + $0x28] sm:$0xff]  ;;  %v268_v18 = vld [vmem:[%s1030_s3 + $0x30] sm:$0xff]  ;;  %vm833_vm1 = vmmov 0   ;;  %s836_s23 = smov [#allocation2]  }
   0xb   :  { %v269_v19 = vld [vmem:[%s1030_s3 + $0x38] sm:$0xff]  ;;  %v33_v20 = vld [vmem:[%s1027_s0 + $0x30] sm:$0xff]  ;;  %v270_v23 = vld [vmem:[%s1030_s3 + $0x40] sm:$0xff]  ;;  %s530_s24 = sshll.u32 %s836_s23, 4  ;;  %s531_s24 = int_to_ptr.vmem [resolvable:$true] %s530_s24 }
   0xc   :  { %631 = vmatmul.mubr.msk.f32.gmra.mrb[2].mxu1 %vm52_vm0, %v30_v11  ;;  %v758_v21 = vpack.c.bf16 %v269_v19, %v268_v18  ;;  %v34_v22 = vld [vmem:[%s1027_s0 + $0x38] sm:$0xff]  ;;  %v271_v24 = vld [vmem:[%s1030_s3 + $0x48] sm:$0xff]  ;;  %v35_v25 = vld [vmem:[%s1027_s0 + $0x40] sm:$0xff]  ;;  %s808_s25 = scalar_lea.vmem %s531_s24, 128  ;;  %p813_p1 = scmp.lt.s32.totalorder %s531_s24, %s531_s24 }
   0xd   :  { %633 = vmatprep.mubr.msk.f32.mxu1 %vm52_vm0, %v31_v15  ;;  %753 = vmatpush3.bf16.msra.mxu1 %v750_v12  ;;  %v762_v26 = vpack.c.bf16 %v271_v24, %v270_v23  ;;  %v36_v27 = vld [vmem:[%s1027_s0 + $0x48] sm:$0xff]  ;;  %v272_v28 = vld [vmem:[%s1030_s3 + $0x50] sm:$0xff]  ;;  %v273_v29 = vld [vmem:[%s1030_s3 + $0x58] sm:$0xff]  ;;  %p809_p0 = scmp.ne.s32.totalorder %s531_s24, %s808_s25  ;;  %p814_p2 = scmp.lt.s32.totalorder %s808_s25, %s808_s25 }
   0xe   :  { %755 = vmatprep.subr.bf16.mxu1 %v754_v16  ;;  %v37_v30 = vld [vmem:[%s1027_s0 + $0x50] sm:$0xff]  ;;  %v766_v31 = vpack.c.bf16 %v273_v29, %v272_v28  ;;  %v38_v32 = vld [vmem:[%s1027_s0 + $0x58] sm:$0xff]  ;;  %v274_v33 = vld [vmem:[%s1030_s3 + $0x60] sm:$0xff]  ;;  %v832_v28 = vmov 0.0|0.0   ;;  %v834_v29 = vmov 0.0  }
   0xf   :  { %v275_v34 = vld [vmem:[%s1030_s3 + $0x68] sm:$0xff]  ;;  %v39_v35 = vld [vmem:[%s1027_s0 + $0x60] sm:$0xff]  ;;  %v41_v38 = vld [vmem:[%s1027_s0 + $0x70] sm:$0xff]  ;;  %778 = vmatprep.subr.bf16.mxu0 %v832_v28  ;;  %739 = vmatprep.mubr.msk.f32.mxu0 %vm833_vm1, %v834_v29  ;;  %p815_p3 = por %p814_p2, %p813_p1 }
  0x10   :  { %634 = vmatmul.mubr.msk.f32.gmra.mrb[4].mxu1 %vm52_vm0, %v32_v17  ;;  %v770_v36 = vpack.c.bf16 %v275_v34, %v274_v33  ;;  %v40_v37 = vld [vmem:[%s1027_s0 + $0x68] sm:$0xff]  ;;  %v42_v39 = vld [vmem:[%s1027_s0 + $0x78] sm:$0xff]  ;;  %v276_v40 = vld [vmem:[%s1030_s3 + $0x70] sm:$0xff] }
  0x11   :  { %636 = vmatprep.mubr.msk.f32.mxu1 %vm52_vm0, %v33_v20  ;;  %757 = vmatpush3.bf16.msra.mxu1 %v754_v16  ;;  %v277_v41 = vld [vmem:[%s1030_s3 + $0x78] sm:$0xff]  ;;  %v538_v43 = vld [vmem:[%s1029_s2] ss:$0 sm:$0xff]  ;;  %p816_p4 = pnand %p815_p3, %p809_p0 }
  0x12   :  { %759 = vmatprep.subr.bf16.mxu1 %v758_v21  ;;  %v774_v42 = vpack.c.bf16 %v277_v41, %v276_v40 }
  0x14   :  { %637 = vmatmul.mubr.msk.f32.gmra.mrb[6].mxu1 %vm52_vm0, %v34_v22 }
  0x15   :  { %639 = vmatprep.mubr.msk.f32.mxu1 %vm52_vm0, %v35_v25  ;;  %761 = vmatpush3.bf16.msra.mxu1 %v758_v21 }
  0x16   :  { %763 = vmatprep.subr.bf16.mxu1 %v762_v26 }
  0x18   :  { %640 = vmatmul.mubr.msk.f32.gmra.mrb[8].mxu1 %vm52_vm0, %v36_v27 }
  0x19   :  { %642 = vmatprep.mubr.msk.f32.mxu1 %vm52_vm0, %v37_v30  ;;  %765 = vmatpush3.bf16.msra.mxu1 %v762_v26  ;;  %v447_v30 = vld [vmem:[%s1033_s6] sm:$0xff] }
  0x1a   :  { %767 = vmatprep.subr.bf16.mxu1 %v766_v31 }
  0x1c   :  { %643 = vmatmul.mubr.msk.f32.gmra.mrb[10].mxu1 %vm52_vm0, %v38_v32  ;;  %v555_v32 = vld [vmem:[%s1031_s4] ss:$0 sm:$0xff] }
  0x1d   :  { %645 = vmatprep.mubr.msk.f32.mxu1 %vm52_vm0, %v39_v35  ;;  %769 = vmatpush3.bf16.msra.mxu1 %v766_v31  ;;  %v835_v31 = vmov 0  }
  0x1e   :  { %771 = vmatprep.subr.bf16.mxu1 %v770_v36  ;;  %807 = vset.pattern.permute.xlu0 %v835_v31 }
  0x1f   :  { %450 = vperm.xlu0 %807, %v447_v30  }
  0x20   :  { %646 = vmatmul.mubr.msk.f32.gmra.mrb[12].mxu1 %vm52_vm0, %v40_v37 }
  0x21   :  { %648 = vmatprep.mubr.msk.f32.mxu1 %vm52_vm0, %v41_v38  ;;  %773 = vmatpush3.bf16.msra.mxu1 %v770_v36 }
  0x22   :  { %775 = vmatprep.subr.bf16.mxu1 %v774_v42 }
  0x24   :  { %649 = vmatmul.mubr.msk.f32.gmra.mrb[14].mxu1 %vm52_vm0, %v42_v39 }
  0x25   :  { %777 = vmatpush3.bf16.msra.mxu1 %v774_v42 }
  0xdb   :  { %v629_v44 = vpop.f32.mrb[0].mxu1 }
  0xdc   :  { %v173_v45 = vadd.f32 %v629_v44, %v538_v43  ;;  %v167_v46 = vpop.f32.mrb[1].mxu1 }
  0xdd   :  { %v168_v47 = vadd.f32 %v538_v43, %v167_v46 }
  0xde   :  { %v247_v50 = vmax.f32 %v173_v45, 0.0 }
  0xdf   :  { %v246_v48 = vmax.f32 %v168_v47, 0.0  ;;  %v632_v49 = vpop.f32.mrb[2].mxu1 }
  0xe0   :  { %v183_v51 = vadd.f32 %v632_v49, %v538_v43  ;;  %v177_v52 = vpop.f32.mrb[3].mxu1 }
  0xe1   :  { %v178_v53 = vadd.f32 %v538_v43, %v177_v52  ;;  %683 = vmatprep.mubr.f32.mxu1 %v246_v48 }
  0xe2   :  { %v249_v54 = vmax.f32 %v183_v51, 0.0  ;;  %684 = vmatmul.mubr.f32.vlgmr.msra.gmra.mrb[16].mxu1 %v247_v50 }
  0xe3   :  { %v248_v55 = vmax.f32 %v178_v53, 0.0  ;;  %v635_v56 = vpop.f32.mrb[4].mxu1 }
  0xe4   :  { %v193_v57 = vadd.f32 %v635_v56, %v538_v43  ;;  %v187_v58 = vpop.f32.mrb[5].mxu1 }
  0xe5   :  { %686 = vmatprep.mubr.f32.mxu1 %v248_v55  ;;  %v188_v59 = vadd.f32 %v538_v43, %v187_v58 }
  0xe6   :  { %687 = vmatmul.mubr.f32.gmra.mrb[18].mxu1 %v249_v54  ;;  %v251_v60 = vmax.f32 %v193_v57, 0.0 }
  0xe7   :  { %v250_v61 = vmax.f32 %v188_v59, 0.0  ;;  %v638_v62 = vpop.f32.mrb[6].mxu1 }
  0xe8   :  { %v203_v63 = vadd.f32 %v638_v62, %v538_v43  ;;  %v197_v0 = vpop.f32.mrb[7].mxu1 }
  0xe9   :  { %689 = vmatprep.mubr.f32.mxu1 %v250_v61  ;;  %v198_v1 = vadd.f32 %v538_v43, %v197_v0 }
  0xea   :  { %690 = vmatmul.mubr.f32.gmra.mrb[20].mxu1 %v251_v60  ;;  %v253_v2 = vmax.f32 %v203_v63, 0.0 }
  0xeb   :  { %v252_v3 = vmax.f32 %v198_v1, 0.0  ;;  %v641_v4 = vpop.f32.mrb[8].mxu1 }
  0xec   :  { %v213_v5 = vadd.f32 %v641_v4, %v538_v43  ;;  %v207_v6 = vpop.f32.mrb[9].mxu1 }
  0xed   :  { %692 = vmatprep.mubr.f32.mxu1 %v252_v3  ;;  %v208_v7 = vadd.f32 %v538_v43, %v207_v6 }
  0xee   :  { %693 = vmatmul.mubr.f32.gmra.mrb[22].mxu1 %v253_v2  ;;  %v255_v8 = vmax.f32 %v213_v5, 0.0 }
  0xef   :  { %v254_v9 = vmax.f32 %v208_v7, 0.0  ;;  %v644_v10 = vpop.f32.mrb[10].mxu1 }
  0xf0   :  { %v223_v11 = vadd.f32 %v644_v10, %v538_v43  ;;  %v217_v12 = vpop.f32.mrb[11].mxu1 }
  0xf1   :  { %695 = vmatprep.mubr.f32.mxu1 %v254_v9  ;;  %v218_v13 = vadd.f32 %v538_v43, %v217_v12 }
  0xf2   :  { %696 = vmatmul.mubr.f32.gmra.mrb[24].mxu1 %v255_v8  ;;  %v257_v14 = vmax.f32 %v223_v11, 0.0 }
  0xf3   :  { %v256_v15 = vmax.f32 %v218_v13, 0.0  ;;  %v647_v16 = vpop.f32.mrb[12].mxu1 }
  0xf4   :  { %v233_v17 = vadd.f32 %v647_v16, %v538_v43  ;;  %v227_v18 = vpop.f32.mrb[13].mxu1 }
  0xf5   :  { %698 = vmatprep.mubr.f32.mxu1 %v256_v15  ;;  %v228_v19 = vadd.f32 %v538_v43, %v227_v18 }
  0xf6   :  { %699 = vmatmul.mubr.f32.gmra.mrb[26].mxu1 %v257_v14  ;;  %v259_v20 = vmax.f32 %v233_v17, 0.0 }
  0xf7   :  { %v258_v21 = vmax.f32 %v228_v19, 0.0  ;;  %v650_v22 = vpop.f32.mrb[14].mxu1 }
  0xf8   :  { %v243_v23 = vadd.f32 %v650_v22, %v538_v43  ;;  %v237_v24 = vpop.f32.mrb[15].mxu1 }
  0xf9   :  { %701 = vmatprep.mubr.f32.mxu1 %v258_v21  ;;  %v238_v25 = vadd.f32 %v538_v43, %v237_v24 }
  0xfa   :  { %702 = vmatmul.mubr.f32.gmra.mrb[28].mxu1 %v259_v20  ;;  %v261_v26 = vmax.f32 %v243_v23, 0.0 }
  0xfb   :  { %v260_v27 = vmax.f32 %v238_v25, 0.0  ;;  %v446_v25 = vld [vmem:[%s1032_s5] sm:$0xff] }
  0xfd   :  { %704 = vmatprep.mubr.f32.mxu1 %v260_v27 }
  0xfe   :  { %705 = vmatmul.mubr.f32.gmra.mrb[30].mxu1 %v261_v26  ;;  %v451_v26 = vpop.permute.xlu0 %450 }
 0x1b5   :  { %v685_v33 = vpop.f32.mrb[16].mxu1 }
 0x1b6   :  { %v357_v34 = vadd.f32 %v685_v33, %v555_v32  ;;  %v351_v35 = vpop.f32.mrb[17].mxu1 }
 0x1b7   :  { %v352_v36 = vadd.f32 %v555_v32, %v351_v35 }
 0x1b8   :  { %v431_v37 = vmax.f32 %v357_v34, 0.0 }
 0x1b9   :  { %v430_v38 = vmax.f32 %v352_v36, 0.0  ;;  %v688_v39 = vpop.f32.mrb[18].mxu1 }
 0x1ba   :  { %v367_v40 = vadd.f32 %v688_v39, %v555_v32  ;;  %v361_v41 = vpop.f32.mrb[19].mxu1 }
 0x1bb   :  { %v362_v42 = vadd.f32 %v555_v32, %v361_v41  ;;  %v779_v43 = vpack.c.bf16 %v431_v37, %v430_v38 }
 0x1bc   :  { %v433_v44 = vmax.f32 %v367_v40, 0.0 }
 0x1bd   :  { %v432_v45 = vmax.f32 %v362_v42, 0.0  ;;  %780 = vmatpush3.bf16.xpose.msra.mxu0 %v779_v43  ;;  %v691_v46 = vpop.f32.mrb[20].mxu1 }
 0x1be   :  { %v377_v47 = vadd.f32 %v691_v46, %v555_v32  ;;  %v371_v48 = vpop.f32.mrb[21].mxu1  ;;  %781 = vmatprep.subr.bf16.mxu0 %v832_v28 }
 0x1bf   :  { %v782_v49 = vpack.c.bf16 %v433_v44, %v432_v45  ;;  %v372_v50 = vadd.f32 %v555_v32, %v371_v48 }
 0x1c0   :  { %v435_v51 = vmax.f32 %v377_v47, 0.0 }
 0x1c1   :  { %v434_v52 = vmax.f32 %v372_v50, 0.0  ;;  %v694_v53 = vpop.f32.mrb[22].mxu1 }
 0x1c2   :  { %v387_v54 = vadd.f32 %v694_v53, %v555_v32  ;;  %v381_v55 = vpop.f32.mrb[23].mxu1 }
 0x1c3   :  { %v785_v56 = vpack.c.bf16 %v435_v51, %v434_v52  ;;  %v382_v57 = vadd.f32 %v555_v32, %v381_v55 }
 0x1c4   :  { %v437_v58 = vmax.f32 %v387_v54, 0.0 }
 0x1c5   :  { %783 = vmatpush3.bf16.xpose.msra.mxu0 %v782_v49  ;;  %v436_v59 = vmax.f32 %v382_v57, 0.0  ;;  %v697_v60 = vpop.f32.mrb[24].mxu1 }
 0x1c6   :  { %784 = vmatprep.subr.bf16.mxu0 %v832_v28  ;;  %v397_v61 = vadd.f32 %v697_v60, %v555_v32  ;;  %v391_v62 = vpop.f32.mrb[25].mxu1 }
 0x1c7   :  { %v788_v63 = vpack.c.bf16 %v437_v58, %v436_v59  ;;  %v392_v0 = vadd.f32 %v555_v32, %v391_v62 }
 0x1c8   :  { %v439_v1 = vmax.f32 %v397_v61, 0.0 }
 0x1c9   :  { %v438_v2 = vmax.f32 %v392_v0, 0.0  ;;  %v700_v3 = vpop.f32.mrb[26].mxu1 }
 0x1ca   :  { %v407_v4 = vadd.f32 %v700_v3, %v555_v32  ;;  %v401_v5 = vpop.f32.mrb[27].mxu1 }
 0x1cb   :  { %v791_v6 = vpack.c.bf16 %v439_v1, %v438_v2  ;;  %v402_v7 = vadd.f32 %v555_v32, %v401_v5 }
 0x1cc   :  { %v441_v8 = vmax.f32 %v407_v4, 0.0 }
 0x1cd   :  { %786 = vmatpush3.bf16.xpose.msra.mxu0 %v785_v56  ;;  %v440_v9 = vmax.f32 %v402_v7, 0.0  ;;  %v703_v10 = vpop.f32.mrb[28].mxu1 }
 0x1ce   :  { %787 = vmatprep.subr.bf16.mxu0 %v832_v28  ;;  %v417_v11 = vadd.f32 %v703_v10, %v555_v32  ;;  %v411_v12 = vpop.f32.mrb[29].mxu1 }
 0x1cf   :  { %v794_v13 = vpack.c.bf16 %v441_v8, %v440_v9  ;;  %v412_v14 = vadd.f32 %v555_v32, %v411_v12 }
 0x1d0   :  { %v443_v15 = vmax.f32 %v417_v11, 0.0 }
 0x1d1   :  { %v442_v16 = vmax.f32 %v412_v14, 0.0  ;;  %v706_v17 = vpop.f32.mrb[30].mxu1 }
 0x1d2   :  { %v427_v18 = vadd.f32 %v706_v17, %v555_v32  ;;  %v421_v19 = vpop.f32.mrb[31].mxu1 }
 0x1d3   :  { %v797_v20 = vpack.c.bf16 %v443_v15, %v442_v16  ;;  %v422_v21 = vadd.f32 %v555_v32, %v421_v19 }
 0x1d4   :  { %v445_v22 = vmax.f32 %v427_v18, 0.0 }
 0x1d5   :  { %789 = vmatpush3.bf16.xpose.msra.mxu0 %v788_v63  ;;  %v444_v23 = vmax.f32 %v422_v21, 0.0 }
 0x1d6   :  { %790 = vmatprep.subr.bf16.mxu0 %v832_v28 }
 0x1d7   :  { %v800_v24 = vpack.c.bf16 %v445_v22, %v444_v23 }
 0x1dd   :  { %792 = vmatpush3.bf16.xpose.msra.mxu0 %v791_v6 }
 0x1de   :  { %793 = vmatprep.subr.bf16.mxu0 %v832_v28 }
 0x1e5   :  { %795 = vmatpush3.bf16.xpose.msra.mxu0 %v794_v13 }
 0x1e6   :  { %796 = vmatprep.subr.bf16.mxu0 %v832_v28 }
 0x1ed   :  { %798 = vmatpush3.bf16.xpose.msra.mxu0 %v797_v20 }
 0x1ee   :  { %799 = vmatprep.subr.bf16.mxu0 %v832_v28 }
 0x1f5   :  { %801 = vmatpush3.bf16.xpose.msra.mxu0 %v800_v24 }
 0x1fc   :  { %740 = vmatmul.mubr.f32.vlgmr.msra.gmra.mrb[0].mxu0 %v446_v25 }
 0x2cf   :  { %v519_v27 = vpop.f32.mrb[0].mxu0 }
 0x2d0   :  { %v520_v29 = vadd.f32 %v519_v27, %v451_v26  ;;  %v741_v30 = vpop.f32.mrb[1].mxu0 }
 0x2d2   :  { %523 = vst [vmem:[#allocation2] sm:$0xff] %v520_v29 }
 0x2d3   :  { %819 = shalt.err (!%p816_p4)
}
 0x2d4   :  { %s820_s5 = scalar_lea.hbm %s1034_s7, 128 }
 0x2d5   :  { %p821_p5 = scmp.ne.s32.totalorder %s1034_s7, %s820_s5  ;;  %p824_p6 = scmp.lt.u32.totalorder %s820_s5, %s1034_s7 }
 0x2d7   :  { %p826_p7 = pnand %p824_p6, %p821_p5 }
 0x2d9   :  { %829 = shalt.err (!%p826_p7)
}
 0x2da   :  { %533 = dma.vmem_to_hbm [thread:$0]  %s531_s24, 128, %s1034_s7, [#allocation3]  }
 0x2db   :  { %830 = dma.done.wait [#allocation3], 128  }
 0x2dc   :  { %831 = vsyncadd [#allocation3], 4294967168 }
 0x2dd   :  { %537 = vsyncpa [#allocation3], 1 }

</bundles_post_ra>
